<compile_context>
chip_gen: v5e
topology: v5e:2x2
jax: 0.10.0
libtpu: 0.0.40
codegen_flags: <defaults>
</compile_context>

<pallas_src>
import functools

import jax
import jax.numpy as jnp
from jax import lax
from jax.experimental import pallas as pl
from jax.experimental.pallas import tpu as pltpu


def vae_kernel(x_ref, eps_ref, we_ref, wmv_ref, wd_ref, b_ref,
               out_ref, kl_ref, *, n_valid, batch):
    """Whole-batch VAE forward in one gridless invocation.

    x_ref   : VMEM (C_in, Np)       bf16 input slab, batch folded into lanes
    eps_ref : VMEM (H, Np)          f32 N(0,1) reparameterization noise
    we_ref  : VMEM (H, C_in)        bf16 encoder pointwise-conv weight
    wmv_ref : VMEM (2H, H)          bf16 fused dense_mean | dense_var weight
    wd_ref  : VMEM (C_out, H)       bf16 decoder pointwise-conv weight
    b_ref   : VMEM (3H+C_out, 1)    f32 packed biases [b_enc | b_mean | b_var | b_dec]
    out_ref : VMEM (C_out, Np)      f32 decoded output slab
    kl_ref  : SMEM (1, 1)           f32 KL term (batch-averaged)
    n_valid : static int, number of real (non-padded) columns = B*T
    batch   : static int, batch size B (for the KL mean over batch)
    """
    H = we_ref.shape[0]
    Np = x_ref.shape[1]

    b_all = b_ref[...]                                           # (3H+C_out, 1) f32
    b_enc = b_all[:H]                                            # (H, 1)
    b_mv = b_all[H:3 * H]                                        # (2H, 1)
    b_dec = b_all[3 * H:]                                        # (C_out, 1)

    # --- Encoder (pointwise conv over channels) + ReLU -> (H, Np), f32 ---
    h = jnp.dot(we_ref[...], x_ref[...],
                preferred_element_type=jnp.float32) + b_enc
    h = jnp.maximum(h, 0.0)

    # --- Fused dense_mean | dense_var -> (2H, Np), f32 ---
    mv = jnp.dot(wmv_ref[...], h.astype(jnp.bfloat16),
                 preferred_element_type=jnp.float32) + b_mv
    mean = mv[:H]                                                # (H, Np)
    var = mv[H:]                                                 # (H, Np) log-variance

    # --- Reparameterization; exp computed once (s*s == exp(var)) ---
    s = jnp.exp(0.5 * var)
    z = mean + s * eps_ref[...]

    # --- KL: torch.mean_b(-0.5 * sum_{H,T}(1 + var - mean^2 - exp(var)))
    #     == -0.5/B * sum over valid columns; padded lanes masked out. ---
    col = lax.broadcasted_iota(jnp.int32, (1, Np), 1)
    valid = col < n_valid
    kl_terms = 1.0 + var - mean * mean - s * s
    kl_ref[0, 0] = (-0.5 / batch) * jnp.sum(jnp.where(valid, kl_terms, 0.0))

    # --- Decoder (pointwise conv over channels) -> (C_out, Np) ---
    dec = jnp.dot(wd_ref[...], z.astype(jnp.bfloat16),
                  preferred_element_type=jnp.float32) + b_dec
    out_ref[...] = dec.astype(out_ref.dtype)


def single_model_forward(x_nct, eps, params):
    """x_nct: (B, C_in, T) NCT input (same layout as the PyTorch module).
    eps:     (H, B*T) standard-normal noise (reparameterization).
    Returns (decoded (B, C_out, T), kl scalar)."""
    B, C_in, T = x_nct.shape
    H = params["we"].shape[0]
    C_out = params["wd"].shape[0]
    BT = B * T
    Np = 128 * pl.cdiv(BT, 128)          # pad lane dim up to the MXU width

    # Lane-dense slab: (B, C_in, T) -> (C_in, B*T) -> zero-pad -> bf16.
    x_slab = jnp.transpose(x_nct, (1, 0, 2)).reshape(C_in, BT)
    x_slab = jnp.pad(x_slab, ((0, 0), (0, Np - BT))).astype(jnp.bfloat16)
    eps_slab = jnp.pad(eps.astype(jnp.float32), ((0, 0), (0, Np - BT)))

    vmem = pl.BlockSpec(memory_space=pltpu.MemorySpace.VMEM)
    smem = pl.BlockSpec(memory_space=pltpu.MemorySpace.SMEM)

    flops = 2 * Np * (H * C_in + 2 * H * H + C_out * H)
    bytes_accessed = (x_slab.size * 2 + eps_slab.size * 4
                      + params["we"].size * 2 + params["wmv"].size * 2
                      + params["wd"].size * 2 + params["b_all"].size * 4
                      + C_out * Np * 4 + 4)

    out_slab, kl = pl.pallas_call(
        functools.partial(vae_kernel, n_valid=BT, batch=B),
        out_shape=(
            jax.ShapeDtypeStruct((C_out, Np), jnp.float32),
            jax.ShapeDtypeStruct((1, 1), jnp.float32),
        ),
        in_specs=[vmem, vmem, vmem, vmem, vmem, vmem],
        out_specs=(vmem, smem),
        cost_estimate=pl.CostEstimate(
            flops=flops, transcendentals=H * Np, bytes_accessed=bytes_accessed),
    )(x_slab, eps_slab, params["we"], params["wmv"], params["wd"], params["b_all"])

    # Un-fold the batch outside the kernel (tiny XLA transpose, essentially free).
    out_nct = out_slab[:, :BT].reshape(C_out, B, T).transpose(1, 0, 2)
    return out_nct, kl[0, 0]


def init_params(key, c_in, hid):
    """Deterministic synthetic parameters in PyTorch (out_features, in_features)
    layout; the kernel computes W @ x over the channel axis."""
    ks = jax.random.split(key, 8)
    s = 0.1
    return {
        "we": s * jax.random.normal(ks[0], (hid, c_in), jnp.float32),
        "be": s * jax.random.normal(ks[1], (hid,), jnp.float32),
        "wm": s * jax.random.normal(ks[2], (hid, hid), jnp.float32),
        "bm": s * jax.random.normal(ks[3], (hid,), jnp.float32),
        "wv": s * jax.random.normal(ks[4], (hid, hid), jnp.float32),
        "bv": s * jax.random.normal(ks[5], (hid,), jnp.float32),
        "wd": s * jax.random.normal(ks[6], (c_in, hid), jnp.float32),
        "bd": s * jax.random.normal(ks[7], (c_in,), jnp.float32),
    }


def fuse_params(p):
    """One-time fusion (outside the jitted forward): dense_mean|dense_var weights
    become a single bf16 matmul operand, weights are cast to bf16 (MXU native,
    ~3x fewer vmatmul passes than f32xf32), and all biases are packed into one
    f32 column vector -> the hot path sees only 4 tensor params."""
    wmv = jnp.concatenate([p["wm"], p["wv"]], axis=0).astype(jnp.bfloat16)   # (2H, H)
    b_all = jnp.concatenate([p["be"], p["bm"], p["bv"], p["bd"]])[:, None]   # (3H+C_out, 1)
    return {
        "we": p["we"].astype(jnp.bfloat16),
        "wmv": wmv,
        "wd": p["wd"].astype(jnp.bfloat16),
        "b_all": b_all.astype(jnp.float32),
    }


if __name__ == "__main__":
    # Module-default shapes (c_in=80, hid=64, seg_len=30) at batch 2.
    B, C_IN, HID, SEG_LEN = 2, 80, 64, 30

    key = jax.random.PRNGKey(0)
    kx, kp, ke = jax.random.split(key, 3)

    x = jax.random.normal(kx, (B, C_IN, SEG_LEN), jnp.float32)       # NCT input
    params = fuse_params(init_params(kp, C_IN, HID))
    eps = jax.random.normal(ke, (HID, B * SEG_LEN), jnp.float32)     # reparam noise

    out, kl = jax.jit(single_model_forward)(x, eps, params)
    jax.block_until_ready((out, kl))

    assert out.shape == (B, C_IN, SEG_LEN)
    assert kl.shape == ()
    assert bool(jnp.isfinite(kl)) and bool(jnp.all(jnp.isfinite(out)))
    print("KERNEL_OK")
</pallas_src>

<mosaic_0001>
module attributes {stable_mosaic.version = 11 : i64} {
  func.func @vae_kernel(%arg0: memref<80x128xbf16, #tpu.memory_space<vmem>>, %arg1: memref<64x128xf32, #tpu.memory_space<vmem>>, %arg2: memref<64x80xbf16, #tpu.memory_space<vmem>>, %arg3: memref<128x64xbf16, #tpu.memory_space<vmem>>, %arg4: memref<80x64xbf16, #tpu.memory_space<vmem>>, %arg5: memref<272x1xf32, #tpu.memory_space<vmem>>, %arg6: memref<80x128xf32, #tpu.memory_space<vmem>>, %arg7: memref<1x1xf32, #tpu.memory_space<smem>>) attributes {dimension_semantics = [], scalar_prefetch = 0 : i64, scratch_operands = 0 : i64, tpu.core_type = #tpu.core_type<tc>} {
    %c0 = arith.constant 0 : index
    %c0_0 = arith.constant 0 : index
    %0 = vector.load %arg5[%c0, %c0_0] : memref<272x1xf32, #tpu.memory_space<vmem>>, vector<272x1xf32>
    %1 = vector.extract_strided_slice %0 {offsets = [0, 0], sizes = [64, 1], strides = [1, 1]} : vector<272x1xf32> to vector<64x1xf32>
    %2 = vector.extract_strided_slice %0 {offsets = [64, 0], sizes = [128, 1], strides = [1, 1]} : vector<272x1xf32> to vector<128x1xf32>
    %3 = vector.extract_strided_slice %0 {offsets = [192, 0], sizes = [80, 1], strides = [1, 1]} : vector<272x1xf32> to vector<80x1xf32>
    %c0_1 = arith.constant 0 : index
    %c0_2 = arith.constant 0 : index
    %4 = vector.load %arg2[%c0_1, %c0_2] : memref<64x80xbf16, #tpu.memory_space<vmem>>, vector<64x80xbf16>
    %c0_3 = arith.constant 0 : index
    %c0_4 = arith.constant 0 : index
    %5 = vector.load %arg0[%c0_3, %c0_4] : memref<80x128xbf16, #tpu.memory_space<vmem>>, vector<80x128xbf16>
    %cst = arith.constant dense<0.000000e+00> : vector<64x128xf32>
    %6 = tpu.matmul %4, %5, %cst {dimension_numbers = #tpu.dot_dimension_numbers<[1], [0], [0], [1], [0, 0, 1, 1], [], []>} : vector<64x80xbf16>, vector<80x128xbf16>, vector<64x128xf32> -> vector<64x128xf32>
    %7 = vector.broadcast %1 : vector<64x1xf32> to vector<64x128xf32>
    %8 = arith.addf %6, %7 : vector<64x128xf32>
    %cst_5 = arith.constant 0.000000e+00 : f32
    %9 = vector.broadcast %cst_5 : f32 to vector<64x128xf32>
    %10 = arith.maximumf %8, %9 : vector<64x128xf32>
    %c0_6 = arith.constant 0 : index
    %c0_7 = arith.constant 0 : index
    %11 = vector.load %arg3[%c0_6, %c0_7] : memref<128x64xbf16, #tpu.memory_space<vmem>>, vector<128x64xbf16>
    %12 = arith.truncf %10 : vector<64x128xf32> to vector<64x128xbf16>
    %cst_8 = arith.constant dense<0.000000e+00> : vector<128x128xf32>
    %13 = tpu.matmul %11, %12, %cst_8 {dimension_numbers = #tpu.dot_dimension_numbers<[1], [0], [0], [1], [0, 0, 1, 1], [], []>} : vector<128x64xbf16>, vector<64x128xbf16>, vector<128x128xf32> -> vector<128x128xf32>
    %14 = vector.broadcast %2 : vector<128x1xf32> to vector<128x128xf32>
    %15 = arith.addf %13, %14 : vector<128x128xf32>
    %16 = vector.extract_strided_slice %15 {offsets = [0, 0], sizes = [64, 128], strides = [1, 1]} : vector<128x128xf32> to vector<64x128xf32>
    %17 = vector.extract_strided_slice %15 {offsets = [64, 0], sizes = [64, 128], strides = [1, 1]} : vector<128x128xf32> to vector<64x128xf32>
    %cst_9 = arith.constant 5.000000e-01 : f32
    %18 = vector.broadcast %cst_9 : f32 to vector<64x128xf32>
    %19 = arith.mulf %18, %17 : vector<64x128xf32>
    %20 = math.exp %19 : vector<64x128xf32>
    %c0_10 = arith.constant 0 : index
    %c0_11 = arith.constant 0 : index
    %21 = vector.load %arg1[%c0_10, %c0_11] : memref<64x128xf32, #tpu.memory_space<vmem>>, vector<64x128xf32>
    %22 = arith.mulf %20, %21 : vector<64x128xf32>
    %23 = arith.addf %16, %22 : vector<64x128xf32>
    %24 = tpu.iota {dimensions = array<i32: 1>} : vector<1x128xi32>
    %c60_i32 = arith.constant 60 : i32
    %25 = vector.broadcast %c60_i32 : i32 to vector<1x128xi32>
    %26 = arith.cmpi slt, %24, %25 : vector<1x128xi32>
    %cst_12 = arith.constant 1.000000e+00 : f32
    %27 = vector.broadcast %cst_12 : f32 to vector<64x128xf32>
    %28 = arith.addf %27, %17 : vector<64x128xf32>
    %29 = arith.mulf %16, %16 : vector<64x128xf32>
    %30 = arith.subf %28, %29 : vector<64x128xf32>
    %31 = arith.mulf %20, %20 : vector<64x128xf32>
    %32 = arith.subf %30, %31 : vector<64x128xf32>
    %cst_13 = arith.constant 0.000000e+00 : f32
    %33 = vector.shape_cast %26 : vector<1x128xi1> to vector<1x128xi1>
    %34 = vector.broadcast %33 : vector<1x128xi1> to vector<64x128xi1>
    %35 = vector.broadcast %cst_13 : f32 to vector<64x128xf32>
    %36 = arith.select %34, %32, %35 : vector<64x128xi1>, vector<64x128xf32>
    %37 = vector.shape_cast %36 : vector<64x128xf32> to vector<1x64x128xf32>
    %cst_14 = arith.constant dense<0.000000e+00> : vector<1xf32>
    %38 = vector.multi_reduction <add>, %37, %cst_14 [1, 2] : vector<1x64x128xf32> to vector<1xf32>
    %39 = vector.shape_cast %38 : vector<1xf32> to vector<1x1x1xf32>
    %40 = vector.extract %39[0, 0, 0] : f32 from vector<1x1x1xf32>
    %cst_15 = arith.constant -2.500000e-01 : f32
    %41 = arith.mulf %cst_15, %40 : f32
    %c0_16 = arith.constant 0 : index
    %c0_17 = arith.constant 0 : index
    %42 = memref.load %arg7[%c0_16, %c0_17] : memref<1x1xf32, #tpu.memory_space<smem>>
    memref.store %41, %arg7[%c0_16, %c0_17] : memref<1x1xf32, #tpu.memory_space<smem>>
    %c0_18 = arith.constant 0 : index
    %c0_19 = arith.constant 0 : index
    %43 = vector.load %arg4[%c0_18, %c0_19] : memref<80x64xbf16, #tpu.memory_space<vmem>>, vector<80x64xbf16>
    %44 = arith.truncf %23 : vector<64x128xf32> to vector<64x128xbf16>
    %cst_20 = arith.constant dense<0.000000e+00> : vector<80x128xf32>
    %45 = tpu.matmul %43, %44, %cst_20 {dimension_numbers = #tpu.dot_dimension_numbers<[1], [0], [0], [1], [0, 0, 1, 1], [], []>} : vector<80x64xbf16>, vector<64x128xbf16>, vector<80x128xf32> -> vector<80x128xf32>
    %46 = vector.broadcast %3 : vector<80x1xf32> to vector<80x128xf32>
    %47 = arith.addf %45, %46 : vector<80x128xf32>
    %c0_21 = arith.constant 0 : index
    %c0_22 = arith.constant 0 : index
    %48 = vector.load %arg6[%c0_21, %c0_22] : memref<80x128xf32, #tpu.memory_space<vmem>>, vector<80x128xf32>
    tpu.vector_store %arg6[%c0_21, %c0_22], %47 {strides = array<i32>} : memref<80x128xf32, #tpu.memory_space<vmem>>, vector<80x128xf32>,
    return
  }
}

</mosaic_0001>

<bundles_post_ra>
// kernel: single_model_forward.1
= control target key start
LH: loop header
LB: loop body
LE: loop exit
PB: predicated region body
PF: predicated region fallthrough
CT: control target
= control target key end

     0   :  { %v888_v2 = vmov 0   ;;  %s1265_s0 = inlined_call_operand.vmem [shape: bf16[80,128], index: 0, kind: input, shape index: {}]   ;;  %s1266_s1 = inlined_call_operand.vmem [shape: f32[64,128], index: 1, kind: input, shape index: {}]   ;;  %s1267_s2 = inlined_call_operand.vmem [shape: bf16[64,80], index: 2, kind: input, shape index: {}]   ;;  %s1268_s3 = inlined_call_operand.vmem [shape: bf16[128,64], index: 3, kind: input, shape index: {}]   ;;  %s1269_s4 = inlined_call_operand.vmem [shape: bf16[80,64], index: 4, kind: input, shape index: {}]   ;;  %s1270_s5 = inlined_call_operand.vmem [shape: f32[272,1], index: 5, kind: input, shape index: {}]   ;;  %s1271_s6 = inlined_call_operand.vmem [shape: f32[80,128], index: 6, kind: output, shape index: {0}]   ;;  %s1272_s7 = inlined_call_operand.hbm [shape: f32[1,1], index: 7, kind: output, shape index: {1}]  }
   0x1   :  { %v31_v0 = vld [vmem:[%s1270_s5 + $0x20] sm:$0xff]  ;;  %856 = vset.pattern.permute.xlu1 %v888_v2  ;;  %857 = vset.pattern.permute.xlu2 %v888_v2  ;;  %v832_v3 = vld [vmem:[%s1265_s0 + $0x18] sm:$0xff]  ;;  %v33_v4 = vld [vmem:[%s1270_s5 + $0x30] sm:$0xff] }
   0x2   :  { %v833_v1 = vld [vmem:[%s1265_s0 + $0x20] sm:$0xff]  ;;  %101 = vperm.xlu1 %856, %v31_v0   ;;  %v29_v5 = vld [vmem:[%s1270_s5 + $0x10] sm:$0xff]  ;;  %855 = vset.pattern.permute.xlu0 %v888_v2 }
   0x3   :  { %185 = vmatpush.bf16.msra.mxu0 %v833_v1  ;;  %91 = vperm.xlu2 %857, %v29_v5   ;;  %v831_v6 = vld [vmem:[%s1265_s0 + $0x10] sm:$0xff] }
   0x4   :  { %111 = vperm.xlu0 %855, %v33_v4  }
   0x7   :  { %186 = vmatpush.bf16.msra.mxu0 %v832_v3 }
   0x8   :  { %13 = vsyncpa [#allocation3], 0  ;;  %v32_v7 = vld [vmem:[%s1270_s5 + $0x28] sm:$0xff]  ;;  %v30_v8 = vld [vmem:[%s1270_s5 + $0x18] sm:$0xff]  ;;  %vm169_vm0 = vcmask 654336   ;;  %vm359_vm1 = vcmask 523264  }
   0x9   :  { %v34_v9 = vld [vmem:[%s1270_s5 + $0x38] sm:$0xff]  ;;  %v830_v10 = vld [vmem:[%s1265_s0 + $0x8] sm:$0xff]  ;;  %v829_v11 = vld [vmem:[%s1265_s0] sm:$0xff]  ;;  %s708_s15 = sshll.u32 %s1272_s7, 4  ;;  %s889_s19 = smov [#allocation2]   ;;  %s709_s15 = int_to_ptr.hbm [resolvable:$true] %s708_s15 }
   0xa   :  { %106 = vperm.xlu1 %856, %v32_v7   ;;  %v28_v12 = vld [vmem:[%s1270_s5 + $0x8] sm:$0xff]  ;;  %v49_v13 = vld [vmem:[%s1270_s5 + $0xb0] sm:$0xff]  ;;  %v825_v14 = vld [vmem:[%s1267_s2] sm:$0xff] }
   0xb   :  { %187 = vmatpush.bf16.msra.mxu0 %v831_v6  ;;  %96 = vperm.xlu2 %857, %v30_v8   ;;  %v27_v15 = vld [vmem:[%s1270_s5] sm:$0xff]  ;;  %v48_v17 = vld [vmem:[%s1270_s5 + $0xa8] sm:$0xff]  ;;  %v50_v18 = vld [vmem:[%s1270_s5 + $0xb8] sm:$0xff] }
   0xc   :  { %116 = vperm.xlu0 %855, %v34_v9   ;;  %v47_v16 = vld [vmem:[%s1270_s5 + $0xa0] sm:$0xff]  ;;  %v46_v19 = vld [vmem:[%s1270_s5 + $0x98] sm:$0xff]  ;;  %v826_v21 = vld [vmem:[%s1267_s2 + $0x8] sm:$0xff] }
   0xd   :  { %v43_v20 = vld [vmem:[%s1270_s5 + $0x80] sm:$0xff]  ;;  %v45_v22 = vld [vmem:[%s1270_s5 + $0x90] sm:$0xff]  ;;  %v42_v24 = vld [vmem:[%s1270_s5 + $0x78] sm:$0xff] }
   0xe   :  { %v41_v23 = vld [vmem:[%s1270_s5 + $0x70] sm:$0xff]  ;;  %v44_v25 = vld [vmem:[%s1270_s5 + $0x88] sm:$0xff]  ;;  %v39_v29 = vld [vmem:[%s1270_s5 + $0x60] sm:$0xff] }
   0xf   :  { %188 = vmatpush.bf16.msra.mxu0 %v830_v10  ;;  %v40_v26 = vld [vmem:[%s1270_s5 + $0x68] sm:$0xff]  ;;  %v37_v27 = vld [vmem:[%s1270_s5 + $0x50] sm:$0xff]  ;;  %v35_v30 = vld [vmem:[%s1270_s5 + $0x40] sm:$0xff] }
  0x10   :  { %v827_v28 = vld [vmem:[%s1267_s2 + $0x10] sm:$0xff]  ;;  %v36_v31 = vld [vmem:[%s1270_s5 + $0x48] sm:$0xff]  ;;  %v38_v32 = vld [vmem:[%s1270_s5 + $0x58] sm:$0xff] }
  0x11   :  { %v51_v33 = vld [vmem:[%s1270_s5 + $0xc0] sm:$0xff]  ;;  %v52_v34 = vld [vmem:[%s1270_s5 + $0xc8] sm:$0xff]  ;;  %v828_v35 = vld [vmem:[%s1267_s2 + $0x18] sm:$0xff] }
  0x12   :  { %86 = vperm.xlu1 %856, %v28_v12   ;;  %v53_v36 = vld [vmem:[%s1270_s5 + $0xd0] sm:$0xff]  ;;  %v54_v37 = vld [vmem:[%s1270_s5 + $0xd8] sm:$0xff]  ;;  %v55_v38 = vld [vmem:[%s1270_s5 + $0xe0] sm:$0xff] }
  0x13   :  { %189 = vmatpush.bf16.msra.mxu0 %v829_v11  ;;  %311 = vperm.xlu2 %857, %v49_v13   ;;  %v56_v39 = vld [vmem:[%s1270_s5 + $0xe8] sm:$0xff]  ;;  %v57_v40 = vld [vmem:[%s1270_s5 + $0xf0] sm:$0xff]  ;;  %v58_v41 = vld [vmem:[%s1270_s5 + $0xf8] sm:$0xff] }
  0x14   :  { %81 = vperm.xlu0 %855, %v27_v15   ;;  %v59_v42 = vld [vmem:[%s1270_s5 + $0x100] sm:$0xff]  ;;  %v60_v43 = vld [vmem:[%s1270_s5 + $0x108] sm:$0xff] }
  0x16   :  { %756 = vmatmul.msk.bf16.vlgmr.msra.gmra.mxu0 %vm169_vm0, %v825_v14 }
  0x1a   :  { %301 = vperm.xlu1 %856, %v47_v16   ;;  %v834_v16 = vld [vmem:[%s1268_s3] sm:$0xff] }
  0x1b   :  { %306 = vperm.xlu2 %857, %v48_v17   ;;  %v839_v17 = vld [vmem:[%s1268_s3 + $0x28] sm:$0xff] }
  0x1c   :  { %316 = vperm.xlu0 %855, %v50_v18   ;;  %v835_v18 = vld [vmem:[%s1268_s3 + $0x8] sm:$0xff] }
  0x22   :  { %296 = vperm.xlu1 %856, %v46_v19   ;;  %v840_v19 = vld [vmem:[%s1268_s3 + $0x30] sm:$0xff] }
  0x23   :  { %281 = vperm.xlu2 %857, %v43_v20   ;;  %v836_v20 = vld [vmem:[%s1268_s3 + $0x10] sm:$0xff] }
  0x24   :  { %291 = vperm.xlu0 %855, %v45_v22   ;;  %v837_v22 = vld [vmem:[%s1268_s3 + $0x18] sm:$0xff] }
  0x26   :  { %757 = vmatmul.msk.bf16.gmra.mxu0 %vm169_vm0, %v826_v21  ;;  %v841_v21 = vld [vmem:[%s1268_s3 + $0x38] sm:$0xff] }
  0x2a   :  { %271 = vperm.xlu1 %856, %v41_v23   ;;  %v838_v23 = vld [vmem:[%s1268_s3 + $0x20] sm:$0xff] }
  0x2b   :  { %276 = vperm.xlu2 %857, %v42_v24  }
  0x2c   :  { %286 = vperm.xlu0 %855, %v44_v25  }
  0x32   :  { %266 = vperm.xlu1 %856, %v40_v26  }
  0x33   :  { %251 = vperm.xlu2 %857, %v37_v27  }
  0x34   :  { %261 = vperm.xlu0 %855, %v39_v29  }
  0x36   :  { %758 = vmatmul.msk.bf16.gmra.mxu0 %vm169_vm0, %v827_v28 }
  0x3a   :  { %241 = vperm.xlu1 %856, %v35_v30  }
  0x3b   :  { %246 = vperm.xlu2 %857, %v36_v31  }
  0x3c   :  { %256 = vperm.xlu0 %855, %v38_v32  }
  0x42   :  { %569 = vperm.xlu1 %856, %v51_v33  }
  0x43   :  { %574 = vperm.xlu2 %857, %v52_v34  }
  0x46   :  { %759 = vmatmul.msk.bf16.gmra.mxu0 %vm169_vm0, %v828_v35 }
  0x4a   :  { %579 = vperm.xlu1 %856, %v53_v36  }
  0x4b   :  { %584 = vperm.xlu2 %857, %v54_v37  }
  0x52   :  { %589 = vperm.xlu1 %856, %v55_v38  }
  0x53   :  { %594 = vperm.xlu2 %857, %v56_v39  }
  0x5a   :  { %599 = vperm.xlu1 %856, %v57_v40  }
  0x5b   :  { %604 = vperm.xlu2 %857, %v58_v41  }
  0x5d   :  { %v92_v53 = vpop.permute.xlu2 %91 }
  0x62   :  { %609 = vperm.xlu1 %856, %v59_v42  }
  0x63   :  { %614 = vperm.xlu2 %857, %v60_v43  }
  0x65   :  { %v97_v63 = vpop.permute.xlu2 %96 }
  0x6d   :  { %v312_v32 = vpop.permute.xlu2 %311 }
  0x74   :  { %v102_v50 = vpop.permute.xlu1 %101 }
  0x75   :  { %v307_v37 = vpop.permute.xlu2 %306 }
  0x76   :  { %v112_v51 = vpop.permute.xlu0 %111 }
  0x7c   :  { %v107_v54 = vpop.permute.xlu1 %106 }
  0x7e   :  { %v117_v55 = vpop.permute.xlu0 %116 }
  0x84   :  { %v87_v5 = vpop.permute.xlu1 %86 }
  0x86   :  { %v82_v6 = vpop.permute.xlu0 %81 }
  0x8c   :  { %v302_v34 = vpop.permute.xlu1 %301 }
  0x8e   :  { %v317_v31 = vpop.permute.xlu0 %316 }
  0x93   :  { %v191_v44 = vpop.f32.mrf.mxu0 }
  0x94   :  { %v192_v10 = vadd.f32 %v191_v44, %v82_v6  ;;  %v297_v43 = vpop.permute.xlu1 %296  ;;  %v462_v6 = vld [vmem:[%s1266_s1 + $0x28] sm:$0xff] }
  0x96   :  { %v211_v14 = vmax.f32 %v192_v10, 0.0  ;;  %v292_v36 = vpop.permute.xlu0 %291 }
  0x9b   :  { %v193_v45 = vpop.f32.mrf.mxu0 }
  0x9c   :  { %v194_v7 = vadd.f32 %v193_v45, %v87_v5 }
  0x9e   :  { %v212_v12 = vmax.f32 %v194_v7, 0.0  ;;  %v464_v7 = vld [vmem:[%s1266_s1 + $0x38] sm:$0xff] }
  0xa0   :  { %v235_v15 = vpack.c.bf16 %v212_v12, %v211_v14 }
  0xa3   :  { %v196_v46 = vpop.f32.mrf.mxu0 }
  0xa4   :  { %v197_v3 = vadd.f32 %v196_v46, %v92_v53 }
  0xa6   :  { %v213_v11 = vmax.f32 %v197_v3, 0.0 }
  0xab   :  { %v198_v47 = vpop.f32.mrf.mxu0 }
  0xac   :  { %v199_v0 = vadd.f32 %v198_v47, %v97_v63 }
  0xae   :  { %v214_v8 = vmax.f32 %v199_v0, 0.0 }
  0xb0   :  { %v236_v13 = vpack.c.bf16 %v214_v8, %v213_v11  ;;  %v461_v11 = vld [vmem:[%s1266_s1 + $0x20] sm:$0xff] }
  0xb3   :  { %v201_v48 = vpop.f32.mrf.mxu0 }
  0xb4   :  { %v202_v60 = vadd.f32 %v201_v48, %v102_v50  ;;  %v1114_v48 = vpop.permute.xlu0 %286 }
  0xb6   :  { %v215_v4 = vmax.f32 %v202_v60, 0.0  ;;  %v272_v60 = vpop.permute.xlu1 %271 }
  0xbb   :  { %v203_v49 = vpop.f32.mrf.mxu0 }
  0xbc   :  { %v204_v58 = vadd.f32 %v203_v49, %v107_v54 }
  0xbe   :  { %v216_v1 = vmax.f32 %v204_v58, 0.0 }
  0xc0   :  { %v237_v9 = vpack.c.bf16 %v216_v1, %v215_v4  ;;  %v262_v1 = vpop.permute.xlu0 %261 }
  0xc3   :  { %v206_v52 = vpop.f32.mrf.mxu0 }
  0xc4   :  { %v207_v56 = vadd.f32 %v206_v52, %v112_v51  ;;  %v282_v52 = vpop.permute.xlu2 %281 }
  0xc6   :  { %v217_v61 = vmax.f32 %v207_v56, 0.0 }
  0xcb   :  { %v208_v57 = vpop.f32.mrf.mxu0 }
  0xcc   :  { %v209_v59 = vadd.f32 %v208_v57, %v117_v55  ;;  %v277_v5 = vpop.permute.xlu2 %276 }
  0xce   :  { %v218_v62 = vmax.f32 %v209_v59, 0.0 }
  0xd0   :  { %v238_v2 = vpack.c.bf16 %v218_v62, %v217_v61 }
  0xd2   :  { %388 = vmatpush.bf16.msra.mxu1 %v238_v2  ;;  %847 = vmatpush.bf16.msra.mxu3 %v238_v2  ;;  %v463_v2 = vld [vmem:[%s1266_s1 + $0x30] sm:$0xff] }
  0xd6   :  { %389 = vmatpush.bf16.msra.mxu1 %v237_v9  ;;  %848 = vmatpush.bf16.msra.mxu3 %v237_v9 }
  0xda   :  { %390 = vmatpush.bf16.msra.mxu1 %v236_v13  ;;  %849 = vmatpush.bf16.msra.mxu3 %v236_v13 }
  0xde   :  { %391 = vmatpush.bf16.msra.mxu1 %v235_v15  ;;  %850 = vmatpush.bf16.msra.mxu3 %v235_v15 }
  0xe1   :  { %792 = vmatmul.msk.bf16.vlgmr.msra.gmra.mxu1 %vm359_vm1, %v834_v16  ;;  %797 = vmatmul.msk.bf16.vlgmr.msra.gmra.mxu3 %vm359_vm1, %v839_v17  ;;  %v267_v17 = vpop.permute.xlu1 %266 }
  0xf1   :  { %793 = vmatmul.msk.bf16.gmra.mxu1 %vm359_vm1, %v835_v18  ;;  %798 = vmatmul.msk.bf16.gmra.mxu3 %vm359_vm1, %v840_v19  ;;  %v460_v18 = vld [vmem:[%s1266_s1 + $0x18] sm:$0xff] }
 0x101   :  { %794 = vmatmul.msk.bf16.gmra.mxu1 %vm359_vm1, %v836_v20  ;;  %799 = vmatmul.msk.bf16.gmra.mxu3 %vm359_vm1, %v841_v21 }
 0x111   :  { %795 = vmatmul.msk.bf16.gmra.mxu1 %vm359_vm1, %v837_v22 }
 0x121   :  { %796 = vmatmul.msk.bf16.gmra.mxu1 %vm359_vm1, %v838_v23 }
 0x15e   :  { %v1095_v24 = vpop.f32.mrf.mxu1 }
 0x164   :  { %v418_v25 = vpop.f32.mrf.mxu3 }
 0x165   :  { %v1116_v49 = vadd.f32 %v418_v25, %v292_v36  ;;  %v459_v25 = vld [vmem:[%s1266_s1 + $0x10] sm:$0xff] }
 0x166   :  { %v1097_v26 = vpop.f32.mrf.mxu1 }
 0x167   :  { %v435_v58 = vmul.f32 0.5, %v1116_v49 }
 0x169   :  { %v445_v63 = vmul.f32 1.442695, %v435_v58 }
 0x16c   :  { %v420_v27 = vpop.f32.mrf.mxu3 }
 0x16d   :  { %v1110_v45 = vadd.f32 %v420_v27, %v297_v43  ;;  %v252_v43 = vpop.permute.xlu2 %251 }
 0x16e   :  { %v1099_v28 = vpop.f32.mrf.mxu1 }
 0x16f   :  { %v436_v53 = vmul.f32 0.5, %v1110_v45 }
 0x171   :  { %v447_v61 = vmul.f32 1.442695, %v436_v53 }
 0x174   :  { %v423_v29 = vpop.f32.mrf.mxu3 }
 0x175   :  { %v1107_v41 = vadd.f32 %v423_v29, %v302_v34  ;;  %v257_v34 = vpop.permute.xlu0 %256 }
 0x176   :  { %v1101_v30 = vpop.f32.mrf.mxu1 }
 0x177   :  { %v437_v47 = vmul.f32 0.5, %v1107_v41 }
 0x179   :  { %v449_v56 = vmul.f32 1.442695, %v437_v47 }
 0x17c   :  { %v425_v33 = vpop.f32.mrf.mxu3 }
 0x17d   :  { %v1103_v39 = vadd.f32 %v425_v33, %v307_v37 }
 0x17e   :  { %v403_v35 = vpop.f32.mrf.mxu1 }
 0x17f   :  { %v438_v46 = vmul.f32 0.5, %v1103_v39  ;;  %v404_v29 = vadd.f32 %v403_v35, %v262_v1 }
 0x181   :  { %v451_v54 = vmul.f32 1.442695, %v438_v46  ;;  %v399_v46 = vadd.f32 %v1099_v28, %v252_v43 }
 0x183   :  { %v494_v28 = vmul.f32 %v399_v46, %v399_v46 }
 0x184   :  { %v428_v38 = vpop.f32.mrf.mxu3 }
 0x185   :  { %v1105_v40 = vadd.f32 %v428_v38, %v312_v32  ;;  %v401_v38 = vadd.f32 %v1101_v30, %v257_v34  ;;  %v242_v30 = vpop.permute.xlu1 %241 }
 0x186   :  { %v405_v42 = vpop.f32.mrf.mxu1 }
 0x187   :  { %v439_v44 = vmul.f32 0.5, %v1105_v40  ;;  %v406_v20 = vadd.f32 %v405_v42, %v267_v17 }
 0x189   :  { %v453_v50 = vmul.f32 1.442695, %v439_v44 }
 0x18b   :  { %858 = vpow2.f32 %v453_v50 }
 0x18c   :  { %v430_v51 = vpop.f32.mrf.mxu3  ;;  %860 = vpow2.f32 %v451_v54 }
 0x18d   :  { %v1119_v55 = vadd.f32 %v430_v51, %v317_v31  ;;  %862 = vpow2.f32 %v449_v56 }
 0x18e   :  { %v408_v57 = vpop.f32.mrf.mxu1 }
 0x18f   :  { %v440_v59 = vmul.f32 0.5, %v1119_v55  ;;  %v1145_v13 = vadd.f32 %v408_v57, %v272_v60  ;;  %v481_v57 = vlaneseq }
 0x191   :  { %v455_v62 = vmul.f32 1.442695, %v440_v59  ;;  %v1123_v0 = vpop.eup %858  ;;  %v394_v59 = vadd.f32 %v1095_v24, %v242_v30  ;;  %v487_v24 = vadd.f32 1.0, %v1110_v45  ;;  %v497_v45 = vmul.f32 %v406_v20, %v406_v20 }
 0x192   :  { %v1128_v4 = vpop.eup %860  ;;  %v471_v9 = vmul.f32 %v1123_v0, %v463_v2  ;;  %v486_v2 = vadd.f32 1.0, %v1116_v49 }
 0x193   :  { %864 = vpow2.f32 %v455_v62  ;;  %v1136_v8 = vpop.eup %862  ;;  %v470_v12 = vmul.f32 %v1128_v4, %v462_v6  ;;  %v513_v43 = vmul.f32 %v1128_v4, %v1128_v4  ;;  %v491_v4 = vadd.f32 1.0, %v1119_v55 }
 0x194   :  { %866 = vpow2.f32 %v447_v61  ;;  %v469_v19 = vmul.f32 %v1136_v8, %v461_v11  ;;  %v479_v21 = vadd.f32 %v471_v9, %v1145_v13  ;;  %v247_v61 = vpop.permute.xlu2 %246  ;;  %v502_v9 = vsub.f32 %v486_v2, %v494_v28  ;;  %v844_v2 = vld [vmem:[%s1269_s4 + $0x10] sm:$0xff] }
 0x195   :  { %868 = vpow2.f32 %v445_v63  ;;  %v478_v31 = vadd.f32 %v470_v12, %v406_v20  ;;  %v396_v62 = vadd.f32 %v1097_v26, %v247_v61  ;;  %v1167_v63 = vand.u32 127, %v481_v57  ;;  %v458_v26 = vld [vmem:[%s1266_s1 + $0x8] sm:$0xff] }
 0x196   :  { %v410_v3 = vpop.f32.mrf.mxu1  ;;  %v477_v42 = vadd.f32 %v469_v19, %v404_v29  ;;  %v496_v12 = vmul.f32 %v404_v29, %v404_v29  ;;  %v488_v19 = vadd.f32 1.0, %v1107_v41  ;;  %v512_v34 = vmul.f32 %v1136_v8, %v1136_v8 }
 0x197   :  { %v1147_v14 = vadd.f32 %v410_v3, %v277_v5  ;;  %v495_v3 = vmul.f32 %v401_v38, %v401_v38  ;;  %v492_v5 = vmul.f32 %v394_v59, %v394_v59  ;;  %vm483_vm2 = vcmp.lt.s32.totalorder %v1167_v63, 60  ;;  %v846_v63 = vld [vmem:[%s1269_s4 + $0x20] sm:$0xff] }
 0x198   :  { %v565_v50 = vpack.c.bf16 %v478_v31, %v477_v42 }
 0x199   :  { %v1139_v10 = vpop.eup %864 }
 0x19a   :  { %v472_v15 = vmul.f32 %v1139_v10, %v464_v7  ;;  %v1150_v16 = vpop.eup %866 }
 0x19b   :  { %v869_v23 = vpop.eup %868  ;;  %v468_v27 = vmul.f32 %v1150_v16, %v460_v18 }
 0x19c   :  { %v480_v22 = vadd.f32 %v472_v15, %v1147_v14  ;;  %v467_v37 = vmul.f32 %v869_v23, %v459_v25  ;;  %v510_v11 = vmul.f32 %v869_v23, %v869_v23  ;;  %v493_v15 = vmul.f32 %v396_v62, %v396_v62 }
 0x19d   :  { %v476_v47 = vadd.f32 %v468_v27, %v401_v38 }
 0x19e   :  { %v413_v32 = vpop.f32.mrf.mxu1  ;;  %v566_v33 = vpack.c.bf16 %v480_v22, %v479_v21  ;;  %v475_v53 = vadd.f32 %v467_v37, %v399_v46  ;;  %v503_v21 = vsub.f32 %v487_v24, %v495_v3  ;;  %v511_v22 = vmul.f32 %v1150_v16, %v1150_v16  ;;  %v845_v3 = vld [vmem:[%s1269_s4 + $0x18] sm:$0xff]  ;;  %v570_v24 = vpop.permute.xlu1 %569 }
 0x19f   :  { %v414_v36 = vadd.f32 %v413_v32, %v282_v52  ;;  %v518_v31 = vsub.f32 %v502_v9, %v510_v11  ;;  %v489_v32 = vadd.f32 1.0, %v1103_v39  ;;  %v490_v16 = vadd.f32 1.0, %v1105_v40  ;;  %v842_v40 = vld [vmem:[%s1269_s4] sm:$0xff] }
 0x1a0   :  { %661 = vmatpush.bf16.msra.mxu2 %v566_v33  ;;  %v564_v54 = vpack.c.bf16 %v476_v47, %v475_v53  ;;  %v504_v33 = vsub.f32 %v488_v19, %v496_v12  ;;  %v519_v42 = vsub.f32 %v503_v21, %v511_v22  ;;  %v499_v39 = vmul.f32 %v1147_v14, %v1147_v14 }
 0x1a1   :  { %v433_v44 = vmul.f32 0.5, %v414_v36  ;;  %v484_v1 = vadd.f32 1.0, %v414_v36  ;;  %v498_v36 = vmul.f32 %v1145_v13, %v1145_v13  ;;  %v505_v20 = vsub.f32 %v489_v32, %v497_v45 }
 0x1a2   :  { %v528_v46 = vsel %vm483_vm2, %v518_v31, 0.0  ;;  %v514_v14 = vmul.f32 %v1123_v0, %v1123_v0 }
 0x1a3   :  { %v441_v51 = vmul.f32 1.442695, %v433_v44  ;;  %v500_v49 = vsub.f32 %v484_v1, %v492_v5  ;;  %v843_v1 = vld [vmem:[%s1269_s4 + $0x8] sm:$0xff] }
 0x1a4   :  { %662 = vmatpush.bf16.msra.mxu2 %v565_v50  ;;  %v520_v50 = vsub.f32 %v504_v33, %v512_v34 }
 0x1a5   :  { %870 = vpow2.f32 %v441_v51  ;;  %v506_v51 = vsub.f32 %v490_v16, %v498_v36 }
 0x1a6   :  { %v415_v35 = vpop.f32.mrf.mxu1  ;;  %v530_v55 = vsel %vm483_vm2, %v520_v50, 0.0  ;;  %v580_v19 = vpop.permute.xlu1 %579 }
 0x1a7   :  { %v416_v56 = vadd.f32 %v415_v35, %v1114_v48  ;;  %v457_v48 = vld [vmem:[%s1266_s1] sm:$0xff]  ;;  %v529_v35 = vsel %vm483_vm2, %v519_v42, 0.0  ;;  %v522_v30 = vsub.f32 %v506_v51, %v514_v14 }
 0x1a8   :  { %663 = vmatpush.bf16.msra.mxu2 %v564_v54  ;;  %v521_v54 = vsub.f32 %v505_v20, %v513_v43 }
 0x1a9   :  { %v434_v52 = vmul.f32 0.5, %v416_v56  ;;  %v485_v7 = vadd.f32 1.0, %v416_v56  ;;  %v507_v56 = vsub.f32 %v491_v4, %v499_v39  ;;  %v532_v61 = vsel %vm483_vm2, %v522_v30, 0.0 }
 0x1aa   :  { %v531_v0 = vsel %vm483_vm2, %v521_v54, 0.0 }
 0x1ab   :  { %v443_v58 = vmul.f32 1.442695, %v434_v52  ;;  %v871_v60 = vpop.eup %870  ;;  %v501_v23 = vsub.f32 %v485_v7, %v493_v15  ;;  %v515_v52 = vmul.f32 %v1139_v10, %v1139_v10 }
 0x1ac   :  { %v508_v6 = vmul.f32 %v871_v60, %v871_v60  ;;  %v465_v17 = vmul.f32 %v871_v60, %v457_v48 }
 0x1ad   :  { %872 = vpow2.f32 %v443_v58 }
 0x1ae   :  { %v516_v25 = vsub.f32 %v500_v49, %v508_v6  ;;  %v473_v37 = vadd.f32 %v465_v17, %v394_v59  ;;  %v523_v59 = vsub.f32 %v507_v56, %v515_v52  ;;  %v575_v49 = vpop.permute.xlu2 %574 }
 0x1b0   :  { %v526_v44 = vsel %vm483_vm2, %v516_v25, 0.0  ;;  %v533_v10 = vsel %vm483_vm2, %v523_v59, 0.0 }
 0x1b3   :  { %v873_v18 = vpop.eup %872 }
 0x1b4   :  { %v509_v27 = vmul.f32 %v873_v18, %v873_v18  ;;  %v466_v29 = vmul.f32 %v873_v18, %v458_v26 }
 0x1b6   :  { %v517_v41 = vsub.f32 %v501_v23, %v509_v27  ;;  %v474_v38 = vadd.f32 %v466_v29, %v396_v62  ;;  %v585_v45 = vpop.permute.xlu2 %584  ;;  %v590_v27 = vpop.permute.xlu1 %589 }
 0x1b8   :  { %v527_v8 = vsel %vm483_vm2, %v517_v41, 0.0  ;;  %v563_v13 = vpack.c.bf16 %v474_v38, %v473_v37 }
 0x1b9   :  { %v534_v47 = vadd.f32 %v527_v8, %v526_v44 }
 0x1ba   :  { %664 = vmatpush.bf16.msra.mxu2 %v563_v13 }
 0x1bb   :  { %v535_v53 = vadd.f32 %v534_v47, %v528_v46 }
 0x1bd   :  { %820 = vmatmul.msk.bf16.vlgmr.msra.gmra.mxu2 %vm359_vm1, %v842_v40  ;;  %v536_v57 = vadd.f32 %v535_v53, %v529_v35 }
 0x1be   :  { %v595_v32 = vpop.permute.xlu2 %594  ;;  %v600_v36 = vpop.permute.xlu1 %599 }
 0x1bf   :  { %v537_v58 = vadd.f32 %v536_v57, %v530_v55 }
 0x1c1   :  { %v538_v60 = vadd.f32 %v537_v58, %v531_v0 }
 0x1c3   :  { %v539_v28 = vadd.f32 %v538_v60, %v532_v61 }
 0x1c5   :  { %v540_v62 = vadd.f32 %v539_v28, %v533_v10 }
 0x1c6   :  { %v605_v38 = vpop.permute.xlu2 %604  ;;  %v610_v20 = vpop.permute.xlu1 %609 }
 0x1c7   :  { %541 = vadd.xlane.f32.xlu0 %v540_v62 }
 0x1cd   :  { %821 = vmatmul.msk.bf16.gmra.mxu2 %vm359_vm1, %v843_v1 }
 0x1ce   :  { %v615_v44 = vpop.permute.xlu2 %614 }
 0x1dd   :  { %822 = vmatmul.msk.bf16.gmra.mxu2 %vm359_vm1, %v844_v2 }
 0x1ed   :  { %823 = vmatmul.msk.bf16.gmra.mxu2 %vm359_vm1, %v845_v3 }
 0x1fd   :  { %824 = vmatmul.msk.bf16.gmra.mxu2 %vm359_vm1, %v846_v63 }
 0x23a   :  { %v542_v48 = vpop.xlane.xlu0 %541 }
 0x23b   :  { %v543_v5 = vrot.slane %v542_v48, 4 }
 0x23d   :  { %v544_v6 = vadd.f32 %v543_v5, %v542_v48 }
 0x23f   :  { %v545_v7 = vrot.slane %v544_v6, 2 }
 0x240   :  { %v666_v9 = vpop.f32.mrf.mxu2 }
 0x241   :  { %v667_v11 = vadd.f32 %v666_v9, %v570_v24  ;;  %v546_v12 = vadd.f32 %v545_v7, %v544_v6 }
 0x243   :  { %691 = vst [vmem:[%s1271_s6] sm:$0xff] %v667_v11  ;;  %v547_v26 = vrot.slane %v546_v12, 1 }
 0x245   :  { %v548_v15 = vadd.f32 %v547_v26, %v546_v12 }
 0x247   :  { %851 = vpush %v548_v15 }
 0x248   :  { %v668_v17 = vpop.f32.mrf.mxu2 }
 0x249   :  { %v669_v18 = vadd.f32 %v668_v17, %v575_v49 }
 0x24b   :  { %692 = vst [vmem:[%s1271_s6 + $0x8] sm:$0xff] %v669_v18 }
 0x250   :  { %v671_v21 = vpop.f32.mrf.mxu2 }
 0x251   :  { %v672_v22 = vadd.f32 %v671_v21, %v580_v19 }
 0x253   :  { %693 = vst [vmem:[%s1271_s6 + $0x10] sm:$0xff] %v672_v22 }
 0x258   :  { %v673_v25 = vpop.f32.mrf.mxu2 }
 0x259   :  { %v674_v23 = vadd.f32 %v673_v25, %v585_v45 }
 0x25b   :  { %694 = vst [vmem:[%s1271_s6 + $0x18] sm:$0xff] %v674_v23 }
 0x260   :  { %v676_v29 = vpop.f32.mrf.mxu2 }
 0x261   :  { %v677_v31 = vadd.f32 %v676_v29, %v590_v27 }
 0x263   :  { %695 = vst [vmem:[%s1271_s6 + $0x20] sm:$0xff] %v677_v31 }
 0x268   :  { %v678_v33 = vpop.f32.mrf.mxu2 }
 0x269   :  { %v679_v34 = vadd.f32 %v678_v33, %v595_v32 }
 0x26b   :  { %696 = vst [vmem:[%s1271_s6 + $0x28] sm:$0xff] %v679_v34 }
 0x270   :  { %v681_v41 = vpop.f32.mrf.mxu2 }
 0x271   :  { %v682_v37 = vadd.f32 %v681_v41, %v600_v36 }
 0x273   :  { %697 = vst [vmem:[%s1271_s6 + $0x30] sm:$0xff] %v682_v37 }
 0x278   :  { %s852_s16 = spop %851  ;;  %v683_v42 = vpop.f32.mrf.mxu2 }
 0x279   :  { %s550_s17 = smul.f32 -0.25, %s852_s16  ;;  %v684_v16 = vadd.f32 %v683_v42, %v605_v38 }
 0x27b   :  { %552 = sst [smem:[#allocation2]] %s550_s17  ;;  %698 = vst [vmem:[%s1271_s6 + $0x38] sm:$0xff] %v684_v16 }
 0x27c   :  { %711 = dma.smem_to_hbm %s889_s19, 16, %s709_s15, [#allocation3]  }
 0x280   :  { %v686_v43 = vpop.f32.mrf.mxu2 }
 0x281   :  { %v687_v39 = vadd.f32 %v686_v43, %v610_v20 }
 0x283   :  { %699 = vst [vmem:[%s1271_s6 + $0x40] sm:$0xff] %v687_v39 }
 0x288   :  { %v688_v8 = vpop.f32.mrf.mxu2 }
 0x289   :  { %v689_v13 = vadd.f32 %v688_v8, %v615_v44 }
 0x28b   :  { %700 = vst [vmem:[%s1271_s6 + $0x48] sm:$0xff] %v689_v13 }
 0x28c   :  { %886 = dma.done.wait [#allocation3], 16  }
 0x28d   :  { %887 = vsyncadd [#allocation3], 4294967280 }
 0x28e   :  { %718 = sfence }
 0x28f   :  { %719 = vsyncpa [#allocation3], 1 }

</bundles_post_ra>
